<compile_context>
chip_gen: v5e
topology: v5e:2x2
jax: 0.10.0
libtpu: 0.0.40
codegen_flags: <defaults>
</compile_context>

<pallas_src>
import jax
import jax.numpy as jnp
from jax.experimental import pallas as pl
from jax.experimental.pallas import tpu as pltpu


HIDDEN_PAD = 128              # lane-dense hidden width (vreg lane axis = 128)
OUT_PAD = 128                 # lane-dense output width (unmasked vst)
COMPUTE_DTYPE = jnp.bfloat16  # MXU-native operand dtype; accumulation stays f32
MAX_BATCH_TILE = 4096         # big tiles amortize per-step overhead; <5 MB VMEM
SINGLE_STEP_MAX = 128         # below this, a single grid step (inference path)


def qnet_kernel(x_ref, w1_ref, b1_ref, w2_ref, b2_ref, w3_ref, b3_ref, o_ref):
    """Fused 3-layer MLP on one (TB, in) batch tile.

    Weights/biases are zero-padded to lane-dense widths, so padded hidden
    units are exactly 0 after ReLU and padded output columns are exactly 0;
    the first `out_size` columns match nn.Linear semantics.
    """
    x = x_ref[...].astype(w1_ref.dtype)                              # (TB, in) bf16
    h1 = jnp.dot(x, w1_ref[...], preferred_element_type=jnp.float32) + b1_ref[...]
    h1 = jnp.maximum(h1, 0.0)
    h2 = jnp.dot(h1.astype(w2_ref.dtype), w2_ref[...],
                 preferred_element_type=jnp.float32) + b2_ref[...]
    h2 = jnp.maximum(h2, 0.0)
    y = jnp.dot(h2.astype(w3_ref.dtype), w3_ref[...],
                preferred_element_type=jnp.float32) + b3_ref[...]
    o_ref[...] = y.astype(o_ref.dtype)                               # bf16 store


def _round_up(n, m):
    return -(-n // m) * m


def _choose_batch_tiling(batch, *, max_tile=MAX_BATCH_TILE):
    """Return (padded_batch, tile, n_steps) with padded_batch == tile * n_steps.

    Pads only to a multiple of 16 (sublane-friendly); picks >= 2 grid steps
    for training-size batches so the "parallel" batch axis can use both
    TensorCores on v7x, while keeping tiles large (up to max_tile rows).
    """
    padded = _round_up(batch, 16)
    if padded <= SINGLE_STEP_MAX:
        return padded, padded, 1                    # tiny / inference batch
    n_steps = max(2, -(-padded // max_tile))        # >=2 steps, tiles <= max_tile
    tile = _round_up(-(-padded // n_steps), 16)
    return tile * n_steps, tile, n_steps


def linear_qnet_forward(x, padded_params, out_size):
    """Run the fused Q-net forward. Returns (batch, out_size) float32."""
    w1, b1, w2, b2, w3, b3 = padded_params
    in_size, h_pad = w1.shape
    o_pad = w3.shape[1]
    batch = x.shape[0]

    padded_batch, tb, n_steps = _choose_batch_tiling(batch)
    if padded_batch != batch:
        x = jnp.pad(x, ((0, padded_batch - batch), (0, 0)))

    grid = (n_steps,)

    # Constant index maps keep weights/biases VMEM-resident across the batch
    # grid (no re-DMA); x / out tiles are pipelined under compute.
    resident = lambda i: (0, 0)
    in_specs = [
        pl.BlockSpec((tb, in_size), lambda i: (i, 0)),
        pl.BlockSpec((in_size, h_pad), resident),
        pl.BlockSpec((1, h_pad), resident),
        pl.BlockSpec((h_pad, h_pad), resident),
        pl.BlockSpec((1, h_pad), resident),
        pl.BlockSpec((h_pad, o_pad), resident),
        pl.BlockSpec((1, o_pad), resident),
    ]
    out_spec = pl.BlockSpec((tb, o_pad), lambda i: (i, 0))

    flops = 2 * padded_batch * (in_size * h_pad + h_pad * h_pad + h_pad * o_pad)
    bytes_accessed = (
        x.size * x.dtype.itemsize
        + sum(int(p.size) * p.dtype.itemsize for p in padded_params)
        + padded_batch * o_pad * 2          # bf16 output writeback
    )

    out = pl.pallas_call(
        qnet_kernel,
        out_shape=jax.ShapeDtypeStruct((padded_batch, o_pad), jnp.bfloat16),
        grid=grid,
        in_specs=in_specs,
        out_specs=out_spec,
        compiler_params=pltpu.CompilerParams(
            dimension_semantics=("parallel",)),
        cost_estimate=pl.CostEstimate(
            flops=flops, bytes_accessed=bytes_accessed, transcendentals=0),
    )(x, w1, b1, w2, b2, w3, b3)

    # Strip batch padding / padded output lanes; one fused slice+cast to f32.
    return out[:batch, :out_size].astype(jnp.float32)


def init_params(key, input_size, hidden_size, output_size):
    """PyTorch nn.Linear default init: U(-1/sqrt(fan_in), 1/sqrt(fan_in))."""
    def make_linear(k, fan_in, fan_out):
        kw, kb = jax.random.split(k)
        bound = 1.0 / jnp.sqrt(jnp.float32(fan_in))
        # stored as (in, out) so kernel does x @ W
        w = jax.random.uniform(kw, (fan_in, fan_out), jnp.float32, -bound, bound)
        b = jax.random.uniform(kb, (1, fan_out), jnp.float32, -bound, bound)
        return w, b

    k1, k2, k3 = jax.random.split(key, 3)
    w1, b1 = make_linear(k1, input_size, hidden_size)
    w2, b2 = make_linear(k2, hidden_size, hidden_size)
    w3, b3 = make_linear(k3, hidden_size, output_size)
    return (w1, b1, w2, b2, w3, b3)


def prepare_params(params, hidden_pad=HIDDEN_PAD, out_pad=OUT_PAD,
                   compute_dtype=COMPUTE_DTYPE):
    """Zero-pad to lane-dense widths and cast weights to bf16 (once, at init)."""
    w1, b1, w2, b2, w3, b3 = params
    in_size = w1.shape[0]

    def pad2(a, rows, cols):
        return jnp.pad(a, ((0, rows - a.shape[0]), (0, cols - a.shape[1])))

    w1p = pad2(w1, in_size, hidden_pad).astype(compute_dtype)
    b1p = pad2(b1, 1, hidden_pad).astype(jnp.float32)
    w2p = pad2(w2, hidden_pad, hidden_pad).astype(compute_dtype)
    b2p = pad2(b2, 1, hidden_pad).astype(jnp.float32)
    w3p = pad2(w3, hidden_pad, out_pad).astype(compute_dtype)
    b3p = pad2(b3, 1, out_pad).astype(jnp.float32)
    return (w1p, b1p, w2p, b2p, w3p, b3p)


# TODO(synk): Linear_QNet.save() (torch.save of state_dict) is checkpoint I/O,
# not a forward-pass op; no Pallas equivalent implemented.


if __name__ == "__main__":
    # Shapes consistent with the snake-game Q-net usage of Linear_QNet.
    input_size, hidden_size, output_size = 11, 32, 3

    key = jax.random.PRNGKey(0)
    k_params, k_x1, k_x2 = jax.random.split(key, 3)
    params = init_params(k_params, input_size, hidden_size, output_size)
    padded_params = prepare_params(params)

    def reference(x):
        # Same numerics as the kernel: bf16 operands, f32 bias/accumulate,
        # final result rounded to bf16 (matching the kernel's output store).
        w1, b1, w2, b2, w3, b3 = params
        f = lambda a: a.astype(COMPUTE_DTYPE).astype(jnp.float32)
        dot = lambda a, b: jnp.dot(a, b, precision=jax.lax.Precision.HIGHEST)
        h1 = jnp.maximum(dot(f(x), f(w1)) + b1, 0.0)
        h2 = jnp.maximum(dot(f(h1), f(w2)) + b2, 0.0)
        y = dot(f(h2), f(w3)) + b3
        return y.astype(jnp.bfloat16).astype(jnp.float32)

    # Small inference-style batch (single grid step) and a training-style
    # batch (exercises the multi-step grid + tight batch padding: 300 -> 320).
    for batch, kx in ((8, k_x1), (300, k_x2)):
        x = jax.random.normal(kx, (batch, input_size), dtype=jnp.float32)
        out = jax.block_until_ready(
            linear_qnet_forward(x, padded_params, output_size))
        ref = reference(x)
        assert out.shape == (batch, output_size)
        assert jnp.allclose(out, ref, atol=1e-2, rtol=1e-2), (
            "max abs err", float(jnp.max(jnp.abs(out - ref))))

    print("KERNEL_OK")
</pallas_src>

<mosaic_0001>
module attributes {stable_mosaic.version = 11 : i64} {
  func.func @qnet_kernel(%arg0: i32, %arg1: memref<16x11xf32, #tpu.memory_space<vmem>>, %arg2: memref<11x128xbf16, #tpu.memory_space<vmem>>, %arg3: memref<1x128xf32, #tpu.memory_space<vmem>>, %arg4: memref<128x128xbf16, #tpu.memory_space<vmem>>, %arg5: memref<1x128xf32, #tpu.memory_space<vmem>>, %arg6: memref<128x128xbf16, #tpu.memory_space<vmem>>, %arg7: memref<1x128xf32, #tpu.memory_space<vmem>>, %arg8: memref<16x128xbf16, #tpu.memory_space<vmem>>) attributes {dimension_semantics = [#tpu.dimension_semantics<parallel>], iteration_bounds = array<i64: 1>, scalar_prefetch = 0 : i64, scratch_operands = 0 : i64, tpu.core_type = #tpu.core_type<tc>, window_params = [{transform_indices = @transform_0, window_bounds = array<i64: 16, 11>}, {pipeline_mode = #tpu.pipeline_mode<synchronous>, transform_indices = @transform_1, window_bounds = array<i64: 11, 128>}, {pipeline_mode = #tpu.pipeline_mode<synchronous>, transform_indices = @transform_2, window_bounds = array<i64: 1, 128>}, {pipeline_mode = #tpu.pipeline_mode<synchronous>, transform_indices = @transform_3, window_bounds = array<i64: 128, 128>}, {pipeline_mode = #tpu.pipeline_mode<synchronous>, transform_indices = @transform_4, window_bounds = array<i64: 1, 128>}, {pipeline_mode = #tpu.pipeline_mode<synchronous>, transform_indices = @transform_5, window_bounds = array<i64: 128, 128>}, {pipeline_mode = #tpu.pipeline_mode<synchronous>, transform_indices = @transform_6, window_bounds = array<i64: 1, 128>}, {transform_indices = @transform_7, window_bounds = array<i64: 16, 128>}]} {
    %c0 = arith.constant 0 : index
    %c0_0 = arith.constant 0 : index
    %0 = vector.load %arg1[%c0, %c0_0] : memref<16x11xf32, #tpu.memory_space<vmem>>, vector<16x11xf32>
    %1 = arith.truncf %0 : vector<16x11xf32> to vector<16x11xbf16>
    %c0_1 = arith.constant 0 : index
    %c0_2 = arith.constant 0 : index
    %2 = vector.load %arg2[%c0_1, %c0_2] : memref<11x128xbf16, #tpu.memory_space<vmem>>, vector<11x128xbf16>
    %cst = arith.constant dense<0.000000e+00> : vector<16x128xf32>
    %3 = tpu.matmul %1, %2, %cst {dimension_numbers = #tpu.dot_dimension_numbers<[1], [0], [0], [1], [0, 0, 1, 1], [], []>} : vector<16x11xbf16>, vector<11x128xbf16>, vector<16x128xf32> -> vector<16x128xf32>
    %c0_3 = arith.constant 0 : index
    %c0_4 = arith.constant 0 : index
    %4 = vector.load %arg3[%c0_3, %c0_4] : memref<1x128xf32, #tpu.memory_space<vmem>>, vector<1x128xf32>
    %5 = vector.broadcast %4 : vector<1x128xf32> to vector<16x128xf32>
    %6 = arith.addf %3, %5 : vector<16x128xf32>
    %cst_5 = arith.constant 0.000000e+00 : f32
    %7 = vector.broadcast %cst_5 : f32 to vector<16x128xf32>
    %8 = arith.maximumf %6, %7 : vector<16x128xf32>
    %9 = arith.truncf %8 : vector<16x128xf32> to vector<16x128xbf16>
    %c0_6 = arith.constant 0 : index
    %c0_7 = arith.constant 0 : index
    %10 = vector.load %arg4[%c0_6, %c0_7] : memref<128x128xbf16, #tpu.memory_space<vmem>>, vector<128x128xbf16>
    %cst_8 = arith.constant dense<0.000000e+00> : vector<16x128xf32>
    %11 = tpu.matmul %9, %10, %cst_8 {dimension_numbers = #tpu.dot_dimension_numbers<[1], [0], [0], [1], [0, 0, 1, 1], [], []>} : vector<16x128xbf16>, vector<128x128xbf16>, vector<16x128xf32> -> vector<16x128xf32>
    %c0_9 = arith.constant 0 : index
    %c0_10 = arith.constant 0 : index
    %12 = vector.load %arg5[%c0_9, %c0_10] : memref<1x128xf32, #tpu.memory_space<vmem>>, vector<1x128xf32>
    %13 = vector.broadcast %12 : vector<1x128xf32> to vector<16x128xf32>
    %14 = arith.addf %11, %13 : vector<16x128xf32>
    %cst_11 = arith.constant 0.000000e+00 : f32
    %15 = vector.broadcast %cst_11 : f32 to vector<16x128xf32>
    %16 = arith.maximumf %14, %15 : vector<16x128xf32>
    %17 = arith.truncf %16 : vector<16x128xf32> to vector<16x128xbf16>
    %c0_12 = arith.constant 0 : index
    %c0_13 = arith.constant 0 : index
    %18 = vector.load %arg6[%c0_12, %c0_13] : memref<128x128xbf16, #tpu.memory_space<vmem>>, vector<128x128xbf16>
    %cst_14 = arith.constant dense<0.000000e+00> : vector<16x128xf32>
    %19 = tpu.matmul %17, %18, %cst_14 {dimension_numbers = #tpu.dot_dimension_numbers<[1], [0], [0], [1], [0, 0, 1, 1], [], []>} : vector<16x128xbf16>, vector<128x128xbf16>, vector<16x128xf32> -> vector<16x128xf32>
    %c0_15 = arith.constant 0 : index
    %c0_16 = arith.constant 0 : index
    %20 = vector.load %arg7[%c0_15, %c0_16] : memref<1x128xf32, #tpu.memory_space<vmem>>, vector<1x128xf32>
    %21 = vector.broadcast %20 : vector<1x128xf32> to vector<16x128xf32>
    %22 = arith.addf %19, %21 : vector<16x128xf32>
    %23 = arith.truncf %22 : vector<16x128xf32> to vector<16x128xbf16>
    %c0_17 = arith.constant 0 : index
    %c0_18 = arith.constant 0 : index
    %24 = vector.load %arg8[%c0_17, %c0_18] : memref<16x128xbf16, #tpu.memory_space<vmem>>, vector<16x128xbf16>
    tpu.vector_store %arg8[%c0_17, %c0_18], %23 {strides = array<i32>} : memref<16x128xbf16, #tpu.memory_space<vmem>>, vector<16x128xbf16>,
    return
  }
  func.func @transform_0(%arg0: i32) -> (i32, i32) {
    %c0_i32 = arith.constant 0 : i32
    %c0_i32_0 = arith.constant 0 : i32
    return %arg0, %c0_i32 : i32, i32
  }
  func.func @transform_1(%arg0: i32) -> (i32, i32) {
    %c0_i32 = arith.constant 0 : i32
    %c0_i32_0 = arith.constant 0 : i32
    %c0_i32_1 = arith.constant 0 : i32
    return %c0_i32, %c0_i32_0 : i32, i32
  }
  func.func @transform_2(%arg0: i32) -> (i32, i32) {
    %c0_i32 = arith.constant 0 : i32
    %c0_i32_0 = arith.constant 0 : i32
    %c0_i32_1 = arith.constant 0 : i32
    return %c0_i32, %c0_i32_0 : i32, i32
  }
  func.func @transform_3(%arg0: i32) -> (i32, i32) {
    %c0_i32 = arith.constant 0 : i32
    %c0_i32_0 = arith.constant 0 : i32
    %c0_i32_1 = arith.constant 0 : i32
    return %c0_i32, %c0_i32_0 : i32, i32
  }
  func.func @transform_4(%arg0: i32) -> (i32, i32) {
    %c0_i32 = arith.constant 0 : i32
    %c0_i32_0 = arith.constant 0 : i32
    %c0_i32_1 = arith.constant 0 : i32
    return %c0_i32, %c0_i32_0 : i32, i32
  }
  func.func @transform_5(%arg0: i32) -> (i32, i32) {
    %c0_i32 = arith.constant 0 : i32
    %c0_i32_0 = arith.constant 0 : i32
    %c0_i32_1 = arith.constant 0 : i32
    return %c0_i32, %c0_i32_0 : i32, i32
  }
  func.func @transform_6(%arg0: i32) -> (i32, i32) {
    %c0_i32 = arith.constant 0 : i32
    %c0_i32_0 = arith.constant 0 : i32
    %c0_i32_1 = arith.constant 0 : i32
    return %c0_i32, %c0_i32_0 : i32, i32
  }
  func.func @transform_7(%arg0: i32) -> (i32, i32) {
    %c0_i32 = arith.constant 0 : i32
    %c0_i32_0 = arith.constant 0 : i32
    return %arg0, %c0_i32 : i32, i32
  }
}

</mosaic_0001>

<bundles_post_ra>
// kernel: tpu_custom_call.1
= control target key start
LH: loop header
LB: loop body
LE: loop exit
PB: predicated region body
PF: predicated region fallthrough
CT: control target
= control target key end

     0   :  { %12 = vsyncpa [#allocation3], 0  ;;  %s643_s0 = inlined_call_operand.hbm [shape: f32[16,11], index: 0, kind: input, shape index: {}]   ;;  %s644_s1 = inlined_call_operand.hbm [shape: bf16[11,128], index: 1, kind: input, shape index: {}]   ;;  %s645_s2 = inlined_call_operand.vmem [shape: f32[1,128], index: 2, kind: input, shape index: {}]   ;;  %s646_s3 = inlined_call_operand.hbm [shape: bf16[128,128], index: 3, kind: input, shape index: {}]   ;;  %s647_s4 = inlined_call_operand.vmem [shape: f32[1,128], index: 4, kind: input, shape index: {}]   ;;  %s648_s5 = inlined_call_operand.hbm [shape: bf16[128,128], index: 5, kind: input, shape index: {}]   ;;  %s649_s6 = inlined_call_operand.vmem [shape: f32[1,128], index: 6, kind: input, shape index: {}]   ;;  %s650_s7 = inlined_call_operand.hbm [shape: bf16[16,128], index: 7, kind: output, shape index: {}]  }
   0x1   :  { %13 = vsyncpa [#allocation6], 0 }
   0x2   :  { %14 = vsyncpa [#allocation9], 0  ;;  %s33_s26 = sshll.u32 %s644_s1, 4  ;;  %s34_s26 = int_to_ptr.hbm [resolvable:$true] %s33_s26 }
   0x3   :  { %15 = vsyncpa [#allocation4], 0  ;;  %s557_s27 = smov [#allocation5]   ;;  %s20_s8 = sshll.u32 %s643_s0, 4  ;;  %s21_s8 = int_to_ptr.hbm [resolvable:$true] %s20_s8 }
   0x4   :  { %s35_s28 = sshll.u32 %s557_s27, 4  ;;  %s558_s9 = smov 64   ;;  %s36_s28 = int_to_ptr.vmem [resolvable:$true] %s35_s28 }
   0x5   :  { %s559_s10 = smov 4   ;;  %s560_s11 = smov [#allocation2]  }
   0x6   :  { %41 = dma.hbm_to_vmem [thread:$0]  %s34_s26, 128, %s36_s28, [#allocation6], %s558_s9, %s558_s9, %s559_s10  }
   0x7   :  { %s22_s12 = sshll.u32 %s560_s11, 4  ;;  %s561_s1 = smov 128   ;;  %s23_s12 = int_to_ptr.vmem [resolvable:$true] %s22_s12 }
   0x8   :  { %s562_s13 = smov 8   ;;  %s48_s16 = sshll.u32 %s646_s3, 4  ;;  %s49_s16 = int_to_ptr.hbm [resolvable:$true] %s48_s16 }
   0x9   :  { %28 = dma.hbm_to_vmem [thread:$0]  %s21_s8, 256, %s23_s12, [#allocation3], %s561_s1, %s561_s1, %s562_s13  }
   0xa   :  { %s563_s17 = smov [#allocation7]   ;;  %s63_s20 = sshll.u32 %s648_s5, 4  ;;  %s64_s20 = int_to_ptr.hbm [resolvable:$true] %s63_s20 }
   0xb   :  { %s50_s0 = sshll.u32 %s563_s17, 4  ;;  %s564_s21 = smov [#allocation8]   ;;  %s51_s0 = int_to_ptr.vmem [resolvable:$true] %s50_s0 }
   0xc   :  { %56 = dma.hbm_to_vmem [thread:$0]  %s49_s16, 1024, %s51_s0, [#allocation6], %s558_s9, %s558_s9, %s559_s10  }
   0xd   :  { %s65_s22 = sshll.u32 %s564_s21, 4  ;;  %s66_s22 = int_to_ptr.vmem [resolvable:$true] %s65_s22 }
   0xe   :  { %71 = dma.hbm_to_vmem [thread:$0]  %s64_s20, 1024, %s66_s22, [#allocation9], %s558_s9, %s558_s9, %s559_s10  }
   0xf   :  { %549 = dma.done.wait [#allocation3], 256  }
  0x10   :  { %550 = vsyncadd [#allocation3], 4294967040 }
  0x11   :  { %551 = dma.done.wait [#allocation6], 1152  }
  0x12   :  { %552 = vsyncadd [#allocation6], 4294966144 }
  0x13   :  { %553 = dma.done.wait [#allocation9], 1024  }
  0x14   :  { %554 = vsyncadd [#allocation9], 4294966272  ;;  %vm109_vm0 = vcmask 1044480   ;;  %vm110_vm1 = vcmask 1045504   ;;  %v565_v0 = vmov 65535   ;;  %v91_v6 = vld [vmem:[#allocation2] sm:$0xff] }
  0x15   :  { %v111_v1 = vsel %vm109_vm0, 4294967295, %v565_v0  ;;  %v327_v2 = vld [vmem:[#allocation5] sm:$0xf]  ;;  %v394_v3 = vld [vmem:[#allocation5] sm:$0x30]  ;;  %v92_v7 = vld [vmem:[#allocation2 + $0x8] sm:$0xff] }
  0x16   :  { %v112_v4 = vsel %vm110_vm1, %v111_v1, 0  ;;  %v328_v5 = vor.u32 %v394_v3, %v327_v2  ;;  %v402_v8 = vld [vmem:[#allocation7 + $0x38] sm:$0xff]  ;;  %v401_v10 = vld [vmem:[#allocation7 + $0x30] sm:$0xff]  ;;  %v93_v11 = vpack.c.bf16 %v92_v7, %v91_v6  ;;  %vm105_vm2 = vcmask 89088   ;;  %v400_v12 = vld [vmem:[#allocation7 + $0x28] sm:$0xff]  ;;  %s566_s26 = smov [#allocation10]  }
  0x17   :  { %201 = vmatpush.bf16.msra.mxu1 %v402_v8  ;;  %v399_v13 = vld [vmem:[#allocation7 + $0x20] sm:$0xff]  ;;  %v398_v14 = vld [vmem:[#allocation7 + $0x18] sm:$0xff]  ;;  %v397_v15 = vld [vmem:[#allocation7 + $0x10] sm:$0xff]  ;;  %s308_s27 = sshll.u32 %s566_s26, 4  ;;  %s310_s30 = sshll.u32 %s650_s7, 4  ;;  %s309_s27 = int_to_ptr.vmem [resolvable:$true] %s308_s27  ;;  %s311_s30 = int_to_ptr.hbm [resolvable:$true] %s310_s30 }
  0x18   :  { %v114_v9 = vand.u32 %v328_v5, %v112_v4  ;;  %v396_v16 = vld [vmem:[#allocation7 + $0x8] sm:$0xff]  ;;  %v395_v17 = vld [vmem:[#allocation7] sm:$0xff]  ;;  %v410_v18 = vld [vmem:[#allocation8 + $0x38] sm:$0xff] }
  0x19   :  { %286 = vmatpush.bf16.msra.mxu2 %v410_v18  ;;  %v409_v19 = vld [vmem:[#allocation8 + $0x30] sm:$0xff]  ;;  %v408_v20 = vld [vmem:[#allocation8 + $0x28] sm:$0xff]  ;;  %v407_v21 = vld [vmem:[#allocation8 + $0x20] sm:$0xff] }
  0x1a   :  { %123 = vmatpush.bf16.msra.mxu0 %v114_v9  ;;  %v426_v23 = vld [vmem:[%s645_s2] ss:$0 sm:$0xff]  ;;  %v406_v30 = vld [vmem:[#allocation8 + $0x18] sm:$0xff]  ;;  %v405_v31 = vld [vmem:[#allocation8 + $0x10] sm:$0xff] }
  0x1b   :  { %202 = vmatpush.bf16.msra.mxu1 %v401_v10  ;;  %v404_v32 = vld [vmem:[#allocation8 + $0x8] sm:$0xff]  ;;  %v403_v33 = vld [vmem:[#allocation8] sm:$0xff] }
  0x1c   :  { %v427_v35 = vld [vmem:[%s647_s4] ss:$0 sm:$0xff] }
  0x1d   :  { %329 = vmatmul.msk.bf16.vlgmr.msra.gmra.mxu0 %vm105_vm2, %v93_v11  ;;  %287 = vmatpush.bf16.msra.mxu2 %v409_v19  ;;  %v428_v43 = vld [vmem:[%s649_s6] ss:$0 sm:$0xff] }
  0x1f   :  { %203 = vmatpush.bf16.msra.mxu1 %v400_v12 }
  0x21   :  { %288 = vmatpush.bf16.msra.mxu2 %v408_v20 }
  0x23   :  { %204 = vmatpush.bf16.msra.mxu1 %v399_v13 }
  0x25   :  { %289 = vmatpush.bf16.msra.mxu2 %v407_v21 }
  0x27   :  { %205 = vmatpush.bf16.msra.mxu1 %v398_v14 }
  0x29   :  { %290 = vmatpush.bf16.msra.mxu2 %v406_v30 }
  0x2b   :  { %206 = vmatpush.bf16.msra.mxu1 %v397_v15 }
  0x2d   :  { %291 = vmatpush.bf16.msra.mxu2 %v405_v31 }
  0x2f   :  { %207 = vmatpush.bf16.msra.mxu1 %v396_v16 }
  0x31   :  { %292 = vmatpush.bf16.msra.mxu2 %v404_v32 }
  0x33   :  { %208 = vmatpush.bf16.msra.mxu1 %v395_v17 }
  0x35   :  { %293 = vmatpush.bf16.msra.mxu2 %v403_v33 }
  0x9a   :  { %v125_v22 = vpop.f32.mrf.mxu0 }
  0x9b   :  { %v126_v24 = vadd.f32 %v426_v23, %v125_v22 }
  0x9d   :  { %v130_v27 = vmax.f32 %v126_v24, 0.0 }
  0xa2   :  { %v127_v25 = vpop.f32.mrf.mxu0 }
  0xa3   :  { %v128_v26 = vadd.f32 %v426_v23, %v127_v25 }
  0xa5   :  { %v131_v28 = vmax.f32 %v128_v26, 0.0 }
  0xa7   :  { %v132_v29 = vpack.c.bf16 %v131_v28, %v130_v27 }
  0xa9   :  { %209 = vmatmul.bf16.vlgmr.msra.gmra.mxu1 %v132_v29 }
 0x126   :  { %v210_v34 = vpop.f32.mrf.mxu1 }
 0x127   :  { %v211_v36 = vadd.f32 %v427_v35, %v210_v34 }
 0x129   :  { %v215_v39 = vmax.f32 %v211_v36, 0.0 }
 0x12e   :  { %v212_v37 = vpop.f32.mrf.mxu1 }
 0x12f   :  { %v213_v38 = vadd.f32 %v427_v35, %v212_v37 }
 0x131   :  { %v216_v40 = vmax.f32 %v213_v38, 0.0 }
 0x133   :  { %v217_v41 = vpack.c.bf16 %v216_v40, %v215_v39 }
 0x135   :  { %294 = vmatmul.bf16.vlgmr.msra.gmra.mxu2 %v217_v41 }
 0x1b8   :  { %v295_v42 = vpop.f32.mrf.mxu2 }
 0x1b9   :  { %v296_v45 = vadd.f32 %v428_v43, %v295_v42 }
 0x1c0   :  { %v297_v44 = vpop.f32.mrf.mxu2 }
 0x1c1   :  { %v298_v46 = vadd.f32 %v428_v43, %v297_v44 }
 0x1c3   :  { %v414_v47 = vpack.c.bf16 %v298_v46, %v296_v45 }
 0x1c5   :  { %415 = vst [vmem:[#allocation10] sm:$0xff] %v414_v47  }
 0x1c6   :  { %316 = dma.vmem_to_hbm [thread:$0]  %s309_s27, 128, %s311_s30, [#allocation4], %s558_s9, %s558_s9, %s559_s10  }
 0x1c7   :  { %555 = dma.done.wait [#allocation4], 128  }
 0x1c8   :  { %556 = vsyncadd [#allocation4], 4294967168 }
 0x1c9   :  { %321 = vsyncpa [#allocation3], 1 }
 0x1ca   :  { %322 = vsyncpa [#allocation6], 1 }
 0x1cb   :  { %323 = vsyncpa [#allocation9], 1 }
 0x1cc   :  { %324 = vsyncpa [#allocation4], 1 }

</bundles_post_ra>
